<compile_context>
chip_gen: v5e
topology: v5e:2x2
jax: 0.10.0
libtpu: 0.0.40
codegen_flags: <defaults>
</compile_context>

<pallas_src>
import functools

import jax
import jax.numpy as jnp
from jax.experimental import pallas as pl
from jax.experimental.pallas import tpu as pltpu


def _static_pow(base, gamma):
    """(1 - pt)^gamma.

    For small integer gamma (default gamma=2) use repeated VPU multiplies:
    no EUP transcendentals and no NaN for a slightly-negative base (matches
    torch.pow semantics for integer exponents).  Non-integer gamma falls back
    to pow with the base clamped at 0 to avoid NaN poisoning the mean.
    """
    g = float(gamma)
    if g == int(g) and 0 <= int(g) <= 16:
        n = int(g)
        if n == 0:
            return jnp.ones_like(base)
        out = base
        for _ in range(n - 1):
            out = out * base
        return out
    return jnp.power(jnp.maximum(base, 0.0), g)


def _focal_loss_kernel(logit_ref, target_ref, alpha_ref, o_ref, acc_ref,
                       *, gamma, eps, valid_s, need_mask):
    j = pl.program_id(1)  # spatial-tile index (reduction axis, last)

    # Zero the per-batch accumulator at the start of each batch's spatial loop.
    @pl.when(j == 0)
    def _():
        acc_ref[...] = jnp.zeros_like(acc_ref)

    logit = logit_ref[0].astype(jnp.float32)      # (C, TS)  samples on lanes
    tgt = target_ref[0]                           # (1, TS)  int32
    alpha = alpha_ref[...].astype(jnp.float32)    # (C, 1)

    c, ts = logit.shape
    cls_ids = jax.lax.broadcasted_iota(jnp.int32, (c, ts), 0)
    onehot = cls_ids == tgt                       # (C, TS) via (1, TS) broadcast

    # gather(1, target)  ==  masked sublane reduction over the class axis.
    pt = jnp.sum(jnp.where(onehot, logit, 0.0), axis=0, keepdims=True) + eps
    alpha_c = jnp.sum(jnp.where(onehot, alpha, 0.0), axis=0, keepdims=True)

    logpt = jnp.log(pt)
    focal = _static_pow(1.0 - pt, gamma)
    loss = -(focal * (alpha_c * logpt))           # (1, TS), lane-dense

    if need_mask:
        # Mask padded spatial positions so they contribute 0 to the sum.
        lane = jax.lax.broadcasted_iota(jnp.int32, (1, ts), 1)
        loss = jnp.where(j * ts + lane < valid_s, loss, 0.0)

    # Element-wise accumulate; full cross-lane reduce happens once per batch.
    acc_ref[...] += loss

    @pl.when(j == pl.num_programs(1) - 1)
    def _():
        o_ref[0] = jnp.sum(acc_ref[...], axis=1, keepdims=True)   # (1, 1)


def _choose_tile_s(s, c):
    """Largest spatial tile that keeps double-buffered inputs + scratch tiny
    relative to every generation's scoped-VMEM budget (v7x: 32 MiB default /
    64 MiB physical), while amortizing the ~0.35 us per-grid-step overhead."""
    bytes_per_sample = (2 * c + 3) * 4            # 2x logits buf + 2x tgt buf + scratch
    budget_rows = (24 * 1024 * 1024) // bytes_per_sample
    cap = max(128, min(32768, (budget_rows // 128) * 128))
    if s <= cap:
        return s                                  # single full-extent tile (layout-legal)
    return cap


def focal_loss_ori(logit, target, alpha, *, gamma=2.0, eps=1e-6):
    """JAX/Pallas equivalent of FocalLoss_Ori.forward (size_average=True).

    logit : softmax scores, (N, C) or (N, C, *spatial)   (f32 or bf16)
    target: integer labels, one per sample/spatial position
    alpha : (C,) per-class weights
    """
    if logit.ndim > 2:
        b, c = logit.shape[0], logit.shape[1]
        s = 1
        for d in logit.shape[2:]:
            s *= d
        logit3 = logit.reshape(b, c, s)                 # free reshape, NO transpose
        target3 = target.reshape(b, 1, s).astype(jnp.int32)
    else:
        # (N, C) path: one small relayout to put samples on the lane axis.
        n, c = logit.shape
        b, s = 1, n
        logit3 = jnp.swapaxes(logit, 0, 1)[None]        # (1, C, N)
        target3 = target.reshape(1, 1, n).astype(jnp.int32)

    tile_s = _choose_tile_s(s, c)
    s_pad = ((s + tile_s - 1) // tile_s) * tile_s
    if s_pad != s:
        logit3 = jnp.pad(logit3, ((0, 0), (0, 0), (0, s_pad - s)))
        target3 = jnp.pad(target3, ((0, 0), (0, 0), (0, s_pad - s)))

    alpha2d = jnp.asarray(alpha, jnp.float32).reshape(c, 1)

    kernel = functools.partial(
        _focal_loss_kernel, gamma=float(gamma), eps=float(eps),
        valid_s=int(s), need_mask=(s_pad != s))

    grid = (b, s_pad // tile_s)
    partials = pl.pallas_call(
        kernel,
        out_shape=jax.ShapeDtypeStruct((b, 1, 1), jnp.float32),
        grid_spec=pltpu.PrefetchScalarGridSpec(
            num_scalar_prefetch=0,
            grid=grid,
            in_specs=[
                pl.BlockSpec((1, c, tile_s), lambda i, j: (i, 0, j)),   # logits
                pl.BlockSpec((1, 1, tile_s), lambda i, j: (i, 0, j)),   # targets
                pl.BlockSpec((c, 1), lambda i, j: (0, 0)),              # alpha
            ],
            out_specs=pl.BlockSpec((1, 1, 1), lambda i, j: (i, 0, 0)),  # per-batch sums
            scratch_shapes=[pltpu.VMEM((1, tile_s), jnp.float32)],
        ),
        compiler_params=pltpu.CompilerParams(
            dimension_semantics=("parallel", "arbitrary"),   # batch || , spatial reduce
            vmem_limit_bytes=32 * 1024 * 1024),
    )(logit3, target3, alpha2d)

    # size_average=True: mean over all real (un-padded) samples.
    return jnp.sum(partials) / (b * s)


def _focal_loss_ref(logit, target, alpha, gamma=2.0, eps=1e-6):
    """Pure-JAX reference mirroring the PyTorch forward."""
    if logit.ndim > 2:
        n, c = logit.shape[0], logit.shape[1]
        logit = jnp.transpose(logit.reshape(n, c, -1), (0, 2, 1)).reshape(-1, c)
    target = target.reshape(-1)
    pt = jnp.take_along_axis(logit, target[:, None], axis=1)[:, 0] + eps
    logpt = jnp.log(pt)
    alpha_c = alpha[target]
    loss = -jnp.power(1.0 - pt, gamma) * alpha_c * logpt
    return jnp.mean(loss)


if __name__ == "__main__":
    key = jax.random.PRNGKey(0)
    k1, k2 = jax.random.split(key)

    num_class = 2
    batch, h, w = 2, 4, 4                      # B * H * W = 32 samples

    # Module __init__ defaults: alpha=[0.25, 0.75], gamma=2, size_average=True
    alpha = jnp.array([0.25, 0.75], dtype=jnp.float32)

    # Raw scores -> softmax probabilities (the module expects softmax scores).
    raw = jax.random.normal(k1, (batch, num_class, h, w), dtype=jnp.float32)
    logit = jax.nn.softmax(raw, axis=1)        # NCHW layout, like PyTorch
    target = jax.random.randint(k2, (batch, h, w), 0, num_class, dtype=jnp.int32)

    loss = focal_loss_ori(logit, target, alpha, gamma=2.0)
    loss = jax.block_until_ready(loss)

    ref = _focal_loss_ref(logit, target, alpha, gamma=2.0)
    assert jnp.allclose(loss, ref, rtol=1e-5, atol=1e-6), (loss, ref)

    print("KERNEL_OK")
</pallas_src>

<mosaic_0001>
module attributes {stable_mosaic.version = 11 : i64} {
  func.func @_focal_loss_kernel(%arg0: i32, %arg1: i32, %arg2: memref<1x2x16xf32, #tpu.memory_space<vmem>>, %arg3: memref<1x1x16xi32, #tpu.memory_space<vmem>>, %arg4: memref<2x1xf32, #tpu.memory_space<vmem>>, %arg5: memref<1x1x1xf32, #tpu.memory_space<vmem>>, %arg6: memref<1x16xf32, #tpu.memory_space<vmem>>) attributes {dimension_semantics = [#tpu.dimension_semantics<parallel>, #tpu.dimension_semantics<arbitrary>], iteration_bounds = array<i64: 2, 1>, scalar_prefetch = 0 : i64, scratch_operands = 1 : i64, tpu.core_type = #tpu.core_type<tc>, window_params = [{transform_indices = @transform_0, window_bounds = array<i64: 1, 2, 16>}, {transform_indices = @transform_1, window_bounds = array<i64: 1, 1, 16>}, {pipeline_mode = #tpu.pipeline_mode<synchronous>, transform_indices = @transform_2, window_bounds = array<i64: 2, 1>}, {transform_indices = @transform_3, window_bounds = array<i64: 1, 1, 1>}]} {
    %c0_i32 = arith.constant 0 : i32
    %0 = arith.cmpi eq, %arg1, %c0_i32 : i32
    %1 = arith.extui %0 : i1 to i32
    %c0_i32_0 = arith.constant 0 : i32
    %2 = arith.cmpi ne, %1, %c0_i32_0 : i32
    scf.if %2 {
      %cst_20 = arith.constant 0.000000e+00 : f32
      %37 = vector.broadcast %cst_20 : f32 to vector<1x16xf32>
      %c0_21 = arith.constant 0 : index
      %c0_22 = arith.constant 0 : index
      %38 = vector.load %arg6[%c0_21, %c0_22] : memref<1x16xf32, #tpu.memory_space<vmem>>, vector<1x16xf32>
      tpu.vector_store %arg6[%c0_21, %c0_22], %37 {strides = array<i32>} : memref<1x16xf32, #tpu.memory_space<vmem>>, vector<1x16xf32>,
    } else {
    }
    %c0 = arith.constant 0 : index
    %c0_1 = arith.constant 0 : index
    %c0_2 = arith.constant 0 : index
    %3 = vector.load %arg2[%c0, %c0_1, %c0_2] : memref<1x2x16xf32, #tpu.memory_space<vmem>>, vector<1x2x16xf32>
    %4 = vector.shape_cast %3 : vector<1x2x16xf32> to vector<2x16xf32>
    %c0_3 = arith.constant 0 : index
    %c0_4 = arith.constant 0 : index
    %c0_5 = arith.constant 0 : index
    %5 = vector.load %arg3[%c0_3, %c0_4, %c0_5] : memref<1x1x16xi32, #tpu.memory_space<vmem>>, vector<1x1x16xi32>
    %6 = vector.shape_cast %5 : vector<1x1x16xi32> to vector<1x16xi32>
    %c0_6 = arith.constant 0 : index
    %c0_7 = arith.constant 0 : index
    %7 = vector.load %arg4[%c0_6, %c0_7] : memref<2x1xf32, #tpu.memory_space<vmem>>, vector<2x1xf32>
    %8 = tpu.iota {dimensions = array<i32: 0>} : vector<2x16xi32>
    %9 = vector.broadcast %6 : vector<1x16xi32> to vector<2x16xi32>
    %10 = arith.cmpi eq, %8, %9 : vector<2x16xi32>
    %cst = arith.constant 0.000000e+00 : f32
    %11 = vector.broadcast %cst : f32 to vector<2x16xf32>
    %12 = arith.select %10, %4, %11 : vector<2x16xi1>, vector<2x16xf32>
    %cst_8 = arith.constant dense<0.000000e+00> : vector<16xf32>
    %13 = vector.multi_reduction <add>, %12, %cst_8 [0] : vector<2x16xf32> to vector<16xf32>
    %14 = vector.shape_cast %13 : vector<16xf32> to vector<1x16xf32>
    %cst_9 = arith.constant 9.99999997E-7 : f32
    %15 = vector.broadcast %cst_9 : f32 to vector<1x16xf32>
    %16 = arith.addf %14, %15 : vector<1x16xf32>
    %cst_10 = arith.constant 0.000000e+00 : f32
    %17 = vector.shape_cast %7 : vector<2x1xf32> to vector<2x1xf32>
    %18 = vector.broadcast %17 : vector<2x1xf32> to vector<2x16xf32>
    %19 = vector.broadcast %cst_10 : f32 to vector<2x16xf32>
    %20 = arith.select %10, %18, %19 : vector<2x16xi1>, vector<2x16xf32>
    %cst_11 = arith.constant dense<0.000000e+00> : vector<16xf32>
    %21 = vector.multi_reduction <add>, %20, %cst_11 [0] : vector<2x16xf32> to vector<16xf32>
    %22 = vector.shape_cast %21 : vector<16xf32> to vector<1x16xf32>
    %23 = math.log %16 : vector<1x16xf32>
    %cst_12 = arith.constant 1.000000e+00 : f32
    %24 = vector.broadcast %cst_12 : f32 to vector<1x16xf32>
    %25 = arith.subf %24, %16 : vector<1x16xf32>
    %26 = arith.mulf %25, %25 : vector<1x16xf32>
    %27 = arith.mulf %22, %23 : vector<1x16xf32>
    %28 = arith.mulf %26, %27 : vector<1x16xf32>
    %cst_13 = arith.constant 0.000000e+00 : f32
    %29 = vector.broadcast %cst_13 : f32 to vector<1x16xf32>
    %30 = arith.subf %29, %28 : vector<1x16xf32>
    %c0_14 = arith.constant 0 : index
    %c0_15 = arith.constant 0 : index
    %31 = vector.load %arg6[%c0_14, %c0_15] : memref<1x16xf32, #tpu.memory_space<vmem>>, vector<1x16xf32>
    %32 = arith.addf %31, %30 : vector<1x16xf32>
    %c0_16 = arith.constant 0 : index
    %c0_17 = arith.constant 0 : index
    %33 = vector.load %arg6[%c0_16, %c0_17] : memref<1x16xf32, #tpu.memory_space<vmem>>, vector<1x16xf32>
    tpu.vector_store %arg6[%c0_16, %c0_17], %32 {strides = array<i32>} : memref<1x16xf32, #tpu.memory_space<vmem>>, vector<1x16xf32>,
    %c0_i32_18 = arith.constant 0 : i32
    %34 = arith.cmpi eq, %arg1, %c0_i32_18 : i32
    %35 = arith.extui %34 : i1 to i32
    %c0_i32_19 = arith.constant 0 : i32
    %36 = arith.cmpi ne, %35, %c0_i32_19 : i32
    scf.if %36 {
      %c0_20 = arith.constant 0 : index
      %c0_21 = arith.constant 0 : index
      %37 = vector.load %arg6[%c0_20, %c0_21] : memref<1x16xf32, #tpu.memory_space<vmem>>, vector<1x16xf32>
      %cst_22 = arith.constant dense<0.000000e+00> : vector<1xf32>
      %38 = vector.multi_reduction <add>, %37, %cst_22 [1] : vector<1x16xf32> to vector<1xf32>
      %39 = vector.shape_cast %38 : vector<1xf32> to vector<1x1xf32>
      %c0_23 = arith.constant 0 : index
      %c0_24 = arith.constant 0 : index
      %c0_25 = arith.constant 0 : index
      %40 = vector.load %arg5[%c0_23, %c0_24, %c0_25] : memref<1x1x1xf32, #tpu.memory_space<vmem>>, vector<1x1x1xf32>
      %41 = vector.shape_cast %40 : vector<1x1x1xf32> to vector<1x1xf32>
      %42 = vector.shape_cast %39 : vector<1x1xf32> to vector<1x1x1xf32>
      tpu.vector_store %arg5[%c0_23, %c0_24, %c0_25], %42 {strides = array<i32>} : memref<1x1x1xf32, #tpu.memory_space<vmem>>, vector<1x1x1xf32>,
    } else {
    }
    return
  }
  func.func @transform_0(%arg0: i32, %arg1: i32) -> (i32, i32, i32) {
    %c0_i32 = arith.constant 0 : i32
    %c0_i32_0 = arith.constant 0 : i32
    return %arg0, %c0_i32, %arg1 : i32, i32, i32
  }
  func.func @transform_1(%arg0: i32, %arg1: i32) -> (i32, i32, i32) {
    %c0_i32 = arith.constant 0 : i32
    %c0_i32_0 = arith.constant 0 : i32
    return %arg0, %c0_i32, %arg1 : i32, i32, i32
  }
  func.func @transform_2(%arg0: i32, %arg1: i32) -> (i32, i32) {
    %c0_i32 = arith.constant 0 : i32
    %c0_i32_0 = arith.constant 0 : i32
    %c0_i32_1 = arith.constant 0 : i32
    return %c0_i32, %c0_i32_0 : i32, i32
  }
  func.func @transform_3(%arg0: i32, %arg1: i32) -> (i32, i32, i32) {
    %c0_i32 = arith.constant 0 : i32
    %c0_i32_0 = arith.constant 0 : i32
    %c0_i32_1 = arith.constant 0 : i32
    return %arg0, %c0_i32, %c0_i32_0 : i32, i32, i32
  }
}

</mosaic_0001>

<bundles_post_ra>
// kernel: tpu_custom_call.1
= control target key start
LH: loop header
LB: loop body
LE: loop exit
PB: predicated region body
PF: predicated region fallthrough
CT: control target
= control target key end

     0   :  { %8 = vsyncpa [#allocation4], 0  ;;  %s638_s0 = inlined_call_operand.hbm [shape: f32[2,2,16], index: 0, kind: input, shape index: {}]   ;;  %s639_s1 = inlined_call_operand.vmem [shape: s32[2,1,16], index: 1, kind: input, shape index: {}]   ;;  %s640_s2 = inlined_call_operand.vmem [shape: f32[2,1], index: 2, kind: input, shape index: {}]   ;;  %s641_s3 = inlined_call_operand.vmem [shape: f32[2,1,1], index: 3, kind: output, shape index: {}]  }
   0x1   :  { %10 = vsyncpa [#allocation4 + $0x1], 0  ;;  %s537_s12 = smov 0   ;;  %s539_s13 = smov 0  }
   0x2   :  { %s541_s14 = smov 0   ;;  %s543_s15 = smov 0  }
   0x3   :  { %s545_s16 = smov 0   ;;  %s547_s17 = smov 0  }
   0x4 LB: > { %s362_s18 = sadd.s32 4294967295, %s513_s17   ;;  %s28_s19 = sadd.s32 1, %s509_s16  ;;  %s513_s17 = sphi %s547_s17, %s16_s17   ;;  %s509_s16 = sphi %s545_s16, %s648_s16   ;;  %s505_s15 = sphi %s543_s15, %s647_s15   ;;  %s501_s14 = sphi %s541_s14, %s646_s14   ;;  %s497_s13 = sphi %s539_s13, %s645_s13   ;;  %s493_s12 = sphi %s537_s12, %s644_s12  }
   0x5   : > { %p30_p0 = scmp.ge.s32.totalorder %s28_s19, 2  ;;  %s37_s20 = sadd.s32 1, %s501_s14 }
   0x6   : > { %p44_p1 = scmp.ne.s32.totalorder %s501_s14, %s497_s13  ;;  %p45_p2 = scmp.eq.s32.totalorder %s513_s17, 0 }
   0x7   : > { %s650_s19 = smov (%p30_p0, %s28_s19), 0  ;;  %p50_p4 = scmp.ne.s32.totalorder %s497_s13, %s493_s12 }
   0x8   : > { %p573_p3 = por %p45_p2, %p44_p1  ;;  %s32_s22 = ssub.s32 %s509_s16, %s650_s19 }
   0x9   : > { %p51_p5 = scmp.eq.s32.totalorder %s362_s18, 0  ;;  %p35_p6 = scmp.eq.s32.totalorder %s32_s22, 0 }
   0xa   : > { %p378_p8 = scmp.lt.s32.totalorder %s513_s17, 2  ;;  %s152_s25 = sand.u32 1, %s501_s14  }
   0xb   : > { %p580_p7 = por %p51_p5, %p50_p4  ;;  %s367_s26 = sshll.u32 %s509_s16, 1 }
   0xc   : > { %s586_s24 = scalar_select %p35_p6, %s501_s14, %s37_s20  }
   0xd   : > { %s366_s27 = sshll.u32 %s152_s25, 1  ;;  %s161_s30 = scalar_lea.hbm %s638_s0, %s367_s26 }
   0xe   : > { %s163_s4 = sshll.u32 %s161_s30, 4  ;;  %s156_s5 = scalar_lea.vmem [#allocation3], %s366_s27  ;;  %s164_s4 = int_to_ptr.hbm [resolvable:$true] %s163_s4 }
   0xf   : > { %s165_s6 = sshll.u32 %s156_s5, 4  ;;  %p375_p9 = pnand %p378_p8, %p573_p3  ;;  %s166_s6 = int_to_ptr.vmem [resolvable:$true] %s165_s6 }
  0x10   : > { %p368_p10 = scmp.ge.s32.totalorder %s513_s17, 1  ;;  %p179_p11 = scmp.lt.s32.totalorder %s513_s17, 3 }
  0x11   : > { %s153_s7 = scalar_lea.sflag [#allocation4], %s152_s25 }
  0x12   : > { %377 = dma.hbm_to_vmem [thread:$0]  (!%p375_p9), %s164_s4, 32, %s166_s6, %s153_s7  }
  0x13   : > { %p180_p12 = pnand %p368_p10, %p179_p11 }
  0x14   : > { %s185_s8 = sand.u32 (!%p180_p12), 1, %s497_s13  }
  0x15   : > { %183 = sbr.rel (%p180_p12) target bundleno = 292 (0x124), region = 32  ;;  %s369_s9 = sshll.u32 (!%p180_p12), %s185_s8, 1 }
  0x16   : > { %s186_s10 = scalar_lea.sflag (!%p180_p12), [#allocation4], %s185_s8  ;;  %s189_s11 = scalar_lea.vmem (!%p180_p12), [#allocation3], %s369_s9 }
  0x1a   : > { %488 = dma.done.wait (%p580_p7), %s186_s10, 32  }
  0x1b   : > { %490 = vsyncadd (%p580_p7), %s186_s10, 4294967264  ;;  %p217_p13 = scmp.lt.s32.totalorder %s505_s15, 1  ;;  %v515_v0 = vmov 0   ;;  %v234_v1 = vld [vmem:[%s640_s2] sm:$0x3]  ;;  %v235_v2 = vlaneseq  ;;  %vm240_vm1 = vcmask 123904  }
  0x1c   : > { %429 = vset.pattern.permute.xlu0 %v515_v0  ;;  %v232_v5 = vld [vmem:[%s189_s11] sm:$0x3]  ;;  %vm230_vm2 = vcmask 122880   ;;  %v516_v10 = vmov 0.0   ;;  %vm280_vm3 = vcmask 0  }
  0x1d   : > { %s652_s15 = smov (!%p217_p13, %s505_s15), 1  ;;  %251 = vperm.xlu0 %429, %v234_v1   ;;  %v236_v3 = vshrl.u32 %v235_v2, 7  ;;  %231 = vst.msk [vmem:[#allocation2] sm:$0x1] %vm230_vm2, %v516_v10 }
  0x1e   : > { %s222_s20 = scalar_lea.vmem %s639_s1, %s652_s15  ;;  %s225_s26 = scalar_lea.vmem %s641_s3, %s652_s15 }
  0x1f   : > { %v430_v4 = vld [vmem:[%s222_s20] ss:$0 sm:$0xff] }
  0x20   : > { %vm238_vm0 = vcmp.eq.s32.totalorder %v236_v3, %v430_v4 }
  0x21   : > { %v239_v6 = vsel %vm238_vm0, %v232_v5, 0.0 }
  0x22   : > { %v241_v7 = vsel %vm240_vm1, %v239_v6, 0.0 }
  0x23   : > { %v242_v8 = vrot.slane %v241_v7, 4 }
  0x24   : > { %v269_v31 = vld [vmem:[#allocation2] sm:$0x1] }
  0x25   : > { %v243_v9 = vadd.f32 %v242_v8, %v241_v7 }
  0x27   : > { %v244_v11 = vrot.slane %v243_v9, 2 }
  0x29   : > { %v245_v12 = vadd.f32 %v244_v11, %v243_v9 }
  0x2b   : > { %v246_v13 = vrot.slane %v245_v12, 1 }
  0x2d   : > { %v247_v14 = vadd.f32 %v246_v13, %v245_v12 }
  0x2f   : > { %v248_v15 = vadd.f32 1e-06, %v247_v14 }
  0x31   : > { %431 = vlog2.f32 %v248_v15  ;;  %v264_v24 = vsub.f32 1.0, %v248_v15 }
  0x33   : > { %v265_v28 = vmul.f32 %v264_v24, %v264_v24 }
  0x37   : > { %v432_v22 = vpop.eup %431 }
  0x38   : > { %v263_v26 = vmul.f32 0.6931472, %v432_v22 }
  0x8f   : > { %v252_v16 = vpop.permute.xlu0 %251 }
  0x90   : > { %v254_v17 = vsel %vm238_vm0, %v252_v16, 0.0 }
  0x91   : > { %v255_v18 = vsel %vm240_vm1, %v254_v17, 0.0 }
  0x92   : > { %v256_v19 = vrot.slane %v255_v18, 4 }
  0x94   : > { %v257_v20 = vadd.f32 %v256_v19, %v255_v18 }
  0x96   : > { %v258_v21 = vrot.slane %v257_v20, 2 }
  0x98   : > { %v259_v23 = vadd.f32 %v258_v21, %v257_v20 }
  0x9a   : > { %v260_v25 = vrot.slane %v259_v23, 1 }
  0x9c   : > { %v261_v27 = vadd.f32 %v260_v25, %v259_v23 }
  0x9e   : > { %v266_v29 = vmul.f32 %v263_v26, %v261_v27 }
  0xa0   : > { %v267_v30 = vmul.f32 %v266_v29, %v265_v28 }
  0xa2   : > { %v268_v32 = vsub.f32 0.0, %v267_v30 }
  0xa4   : > { %v270_v33 = vadd.f32 %v269_v31, %v268_v32 }
  0xa6   : > { %272 = vst.msk [vmem:[#allocation2] sm:$0x1] %vm230_vm2, %v270_v33 }
  0xad   : > { %v276_v34 = vld [vmem:[#allocation2] sm:$0x1] }
  0xae   : > { %v277_v35 = vsel %vm230_vm2, %v276_v34, 0.0 }
  0xaf   : > { %278 = vadd.xlane.f32.xlu0 %v277_v35 }
 0x122   : > { %v279_v36 = vpop.xlane.xlu0 %278 }
 0x123   : > { %281 = vst.msk [vmem:[%s225_s26] sm:$0x1] %vm280_vm3, %v279_v36 }
 0x124 PF: > { %s16_s17 = sadd.s32 1, %s513_s17   ;;  %s644_s12 = smov %s497_s13 }
 0x125   : > { %p13_p0 = scmp.ge.s32.totalorder %s16_s17, 4   ;;  %s645_s13 = smov %s501_s14 }
 0x126   : > { %s646_s14 = smov %s586_s24  ;;  %s647_s15 = smov %s509_s16 }
 0x127   : > { %s648_s16 = smov %s650_s19  ;;  %15 = sbr.rel (!%p13_p0) target bundleno = 4 (0x4), region = 83 }
 0x12c   :  { %299 = vsyncpa [#allocation4], 1 }
 0x12d   :  { %301 = vsyncpa [#allocation4 + $0x1], 1 }

</bundles_post_ra>
